<compile_context>
chip_gen: v6e
topology: v6e:2x2x1
jax: 0.10.0
libtpu: 0.0.40
codegen_flags: <defaults>
</compile_context>

<pallas_src>
import functools

import jax
import jax.numpy as jnp
import numpy as np
from jax.experimental import pallas as pl
from jax.experimental.pallas import tpu as pltpu


def _cdiv(a, b):
    return -(-a // b)


def _round8(x):
    return 8 * _cdiv(x, 8)


def _mhp_kernel(*refs, shared, t_total):
    if shared:
        (x_ref, wkv_ref, bkv_ref, wot_ref, bo_ref,
         out_ref, m_sc, d_sc, c_sc) = refs
        val_ref = x_ref
    else:
        (x_ref, val_ref, wkv_ref, bkv_ref, wot_ref, bo_ref,
         out_ref, m_sc, d_sc, c_sc) = refs

    Tt, Bb, E = x_ref.shape
    t_idx = pl.program_id(1)

    @pl.when(t_idx == 0)
    def _init():
        m_sc[...] = jnp.full_like(m_sc, -1e30)   # finite "-inf" -> no NaN paths
        d_sc[...] = jnp.zeros_like(d_sc)
        c_sc[...] = jnp.zeros_like(c_sc)

    x2 = x_ref[...].reshape(Tt * Bb, E)          # Bb is a multiple of 8 -> free
    if shared:
        # One fused MXU matmul with N = 2E, then split.
        sv = (jnp.dot(x2, wkv_ref[...], preferred_element_type=jnp.float32)
              + bkv_ref[...])                                      # (Tt*Bb, 2E)
        scores = sv[:, :E].reshape(Tt, Bb, E)
        vals = sv[:, E:].reshape(Tt, Bb, E)
    else:
        wkv = wkv_ref[...]
        bkv = bkv_ref[...]
        v2 = val_ref[...].reshape(Tt * Bb, E)
        scores = (jnp.dot(x2, wkv[:, :E], preferred_element_type=jnp.float32)
                  + bkv[:, :E]).reshape(Tt, Bb, E)
        vals = (jnp.dot(v2, wkv[:, E:], preferred_element_type=jnp.float32)
                + bkv[:, E:]).reshape(Tt, Bb, E)

    # Mask padded token rows of the last T block (trace-time static check).
    if t_total % Tt != 0:
        rows = jax.lax.broadcasted_iota(jnp.int32, (Tt, Bb, E), 0) + t_idx * Tt
        valid = rows < t_total
        scores = jnp.where(valid, scores, -1e30)
        vals = jnp.where(valid, vals, 0.0)

    # Online softmax over the token axis fused with the pooled weighted sum.
    m_old = m_sc[...]                                   # (Bb, E)
    m_new = jnp.maximum(m_old, jnp.max(scores, axis=0))
    e = jnp.exp(scores - m_new)                         # (Tt, Bb, E)
    a = jnp.exp(m_old - m_new)                          # rescale factor
    d_sc[...] = a * d_sc[...] + jnp.sum(e, axis=0)
    c_sc[...] = a * c_sc[...] + jnp.sum(e * vals, axis=0)
    m_sc[...] = m_new

    @pl.when(t_idx == pl.num_programs(1) - 1)
    def _finalize():
        ctx = c_sc[...] * pl.reciprocal(d_sc[...], approx=False)
        out = (jnp.dot(ctx.astype(wot_ref.dtype), wot_ref[...],
                       preferred_element_type=jnp.float32) + bo_ref[...])
        out_ref[...] = out.astype(out_ref.dtype)


def multihead_pooling(key, value, params, *, num_heads,
                      block_b=None, block_t=None):
    """key/value: (T, B, E) exactly like the PyTorch module. Returns (B, E)."""
    T, B, E = key.shape
    head_dim = E // num_heads
    assert head_dim * num_heads == E
    shared = (value is None) or (value is key)

    wk, bk, wv, bv, wo, bo = params
    cdt = key.dtype  # MXU operand dtype (bf16 stays bf16; accumulate in f32)

    # Fused projection weight (E, 2E): columns [0:E) are the head-expanded
    # score weight (column h*D+d == linear_keys row h, lane-dense per-head
    # scores), columns [E:2E) are linear_values^T.  Single one-time prep.
    wkx = jnp.repeat(wk, head_dim, axis=0).T.astype(cdt)        # (E, E)
    wvt = wv.T.astype(cdt)                                      # (E, E)
    wkv = jnp.concatenate([wkx, wvt], axis=1)                   # (E, 2E)
    bkv = jnp.concatenate([jnp.repeat(bk, head_dim), bv]
                          ).reshape(1, 2 * E).astype(jnp.float32)
    wot = wo.T.astype(cdt)                                      # (E, E)
    bo2 = bo.reshape(1, E).astype(jnp.float32)

    # Pad tiny batches to 8 so sublanes are dense and the in-kernel merge
    # reshape is layout-free.
    B_orig = B
    if B < 8:
        pad = 8 - B
        key = jnp.pad(key, ((0, 0), (0, pad), (0, 0)))
        if not shared:
            value = jnp.pad(value, ((0, 0), (0, pad), (0, 0)))
        B = 8

    # Generation-aware VMEM / tiling policy.
    try:
        vmem_cap = int(pltpu.get_tpu_info().vmem_capacity_bytes)
    except Exception:
        vmem_cap = 64 << 20                        # conservative (v7x-sized)
    dual_tc = vmem_cap <= (64 << 20)               # v7x: 64 MiB/TC, 2 TCs
    budget = min(int(vmem_cap * 0.80), 112 << 20)  # ~51 MiB v7x, ~102 MiB v5e/v6e

    in_isz = jnp.dtype(key.dtype).itemsize
    w_isz = jnp.dtype(cdt).itemsize
    n_in = 1 if shared else 2

    def vmem_need(bt, bb):
        return (n_in * 2 * bt * bb * E * in_isz        # double-buffered inputs
                + 2 * (3 * E * E * w_isz + 4 * E * 4)  # const weights + biases
                + 6 * bt * bb * E * 4                  # f32 intermediates
                + 3 * bb * E * 4                       # running (m, denom, ctx)
                + 2 * bb * E * in_isz)                 # output block

    if block_b is None or block_t is None:
        nb_min = 2 if (dual_tc and B >= 16) else 1     # keep both v7x TCs busy
        bb = _round8(_cdiv(B, nb_min))
        if bb >= B:
            bb = B                                     # one full batch block
        bt = T
        while vmem_need(bt, bb) > budget and (bt > 8 or bb > 8):
            if bt > 8:                                 # tile the reduction first
                bt = max(8, _cdiv(bt, 2))
            else:
                bb = max(8, _round8(bb // 2))
        if block_b is None:
            block_b = bb
        if block_t is None:
            block_t = bt
    assert block_b == B or block_b % 8 == 0, "block_b must be B or a multiple of 8"

    grid = (_cdiv(B, block_b), _cdiv(T, block_t))
    vmem_limit = int(min(max(vmem_need(block_t, block_b) + (8 << 20), 32 << 20),
                         int(vmem_cap * 0.85)))

    kernel = functools.partial(_mhp_kernel, shared=shared, t_total=T)

    data_spec = pl.BlockSpec((block_t, block_b, E), lambda b, t: (t, b, 0))
    const2 = lambda b, t: (0, 0)
    in_specs = [data_spec]
    operands = [key]
    if not shared:
        in_specs.append(pl.BlockSpec((block_t, block_b, E),
                                     lambda b, t: (t, b, 0)))
        operands.append(value)
    in_specs += [
        pl.BlockSpec((E, 2 * E), const2),   # fused [Wk-expanded | Wv^T]
        pl.BlockSpec((1, 2 * E), const2),   # fused bias
        pl.BlockSpec((E, E), const2),       # Wo^T
        pl.BlockSpec((1, E), const2),       # bo
    ]
    operands += [wkv, bkv, wot, bo2]

    out = pl.pallas_call(
        kernel,
        out_shape=jax.ShapeDtypeStruct((B, E), key.dtype),
        grid_spec=pltpu.PrefetchScalarGridSpec(
            num_scalar_prefetch=0,
            grid=grid,
            in_specs=in_specs,
            out_specs=pl.BlockSpec((block_b, E), lambda b, t: (b, 0)),
            scratch_shapes=[pltpu.VMEM((block_b, E), jnp.float32)] * 3,
        ),
        compiler_params=pltpu.CompilerParams(
            dimension_semantics=("parallel", "arbitrary"),
            vmem_limit_bytes=vmem_limit),
    )(*operands)
    return out[:B_orig]


def _xavier_uniform(key, fan_out, fan_in, dtype=jnp.float32):
    bound = float(np.sqrt(6.0 / (fan_in + fan_out)))
    return jax.random.uniform(key, (fan_out, fan_in), dtype,
                              minval=-bound, maxval=bound)


def make_params(rng, embed_dim, num_heads):
    k = jax.random.split(rng, 6)
    wk = _xavier_uniform(k[0], num_heads, embed_dim)   # linear_keys.weight
    bk = jax.random.uniform(k[1], (num_heads,), jnp.float32, -0.1, 0.1)
    wv = _xavier_uniform(k[2], embed_dim, embed_dim)   # linear_values.weight
    bv = jax.random.uniform(k[3], (embed_dim,), jnp.float32, -0.1, 0.1)
    wo = _xavier_uniform(k[4], embed_dim, embed_dim)   # out_proj.weight
    bo = jax.random.uniform(k[5], (embed_dim,), jnp.float32, -0.1, 0.1)
    return (wk, bk, wv, bv, wo, bo)


def ref_forward(key, value, params, num_heads):
    """Pure-JAX reference mirroring the PyTorch forward (mask=None)."""
    T, B, E = key.shape
    D = E // num_heads
    wk, bk, wv, bv, wo, bo = params
    scores = key @ wk.T + bk                       # (T, B, H)
    vals = (value @ wv.T + bv).reshape(T, B, num_heads, D)
    attn = jax.nn.softmax(scores, axis=0)
    ctx = jnp.sum(attn[..., None] * vals, axis=0)  # (B, H, D)
    ctx = ctx.reshape(B, E)
    return ctx @ wo.T + bo


if __name__ == "__main__":
    T, B, E, H = 8, 2, 32, 4
    rng = jax.random.PRNGKey(0)
    r_key, r_val, r_big, r_par = jax.random.split(rng, 4)

    key = jax.random.normal(r_key, (T, B, E), jnp.float32)
    value = jax.random.normal(r_val, (T, B, E), jnp.float32)
    params = make_params(r_par, E, H)

    # 1) distinct key / value (general two-input path)
    out = jax.block_until_ready(multihead_pooling(key, value, params, num_heads=H))
    np.testing.assert_allclose(np.asarray(out),
                               np.asarray(ref_forward(key, value, params, H)),
                               rtol=2e-5, atol=2e-5)

    # 2) pooling call: same tensor for key and value (deduplicated fused path)
    out_s = jax.block_until_ready(multihead_pooling(key, key, params, num_heads=H))
    np.testing.assert_allclose(np.asarray(out_s),
                               np.asarray(ref_forward(key, key, params, H)),
                               rtol=2e-5, atol=2e-5)

    # 3) T/B tiling path: non-divisible T (token masking) + padded batch block
    T2, B2 = 20, 12
    k2 = jax.random.normal(r_big, (T2, B2, E), jnp.float32)
    out_t = jax.block_until_ready(
        multihead_pooling(k2, k2, params, num_heads=H, block_t=8, block_b=8))
    np.testing.assert_allclose(np.asarray(out_t),
                               np.asarray(ref_forward(k2, k2, params, H)),
                               rtol=2e-5, atol=2e-5)

    print("KERNEL_OK")
</pallas_src>

<mosaic_0001>
module attributes {stable_mosaic.version = 11 : i64} {
  func.func @_mhp_kernel(%arg0: i32, %arg1: i32, %arg2: memref<8x8x32xf32, #tpu.memory_space<vmem>>, %arg3: memref<8x8x32xf32, #tpu.memory_space<vmem>>, %arg4: memref<32x64xf32, #tpu.memory_space<vmem>>, %arg5: memref<1x64xf32, #tpu.memory_space<vmem>>, %arg6: memref<32x32xf32, #tpu.memory_space<vmem>>, %arg7: memref<1x32xf32, #tpu.memory_space<vmem>>, %arg8: memref<8x32xf32, #tpu.memory_space<vmem>>, %arg9: memref<8x32xf32, #tpu.memory_space<vmem>>, %arg10: memref<8x32xf32, #tpu.memory_space<vmem>>, %arg11: memref<8x32xf32, #tpu.memory_space<vmem>>) attributes {dimension_semantics = [#tpu.dimension_semantics<parallel>, #tpu.dimension_semantics<arbitrary>], iteration_bounds = array<i64: 1, 1>, scalar_prefetch = 0 : i64, scratch_operands = 3 : i64, tpu.core_type = #tpu.core_type<tc>, window_params = [{transform_indices = @transform_0, window_bounds = array<i64: 8, 8, 32>}, {transform_indices = @transform_1, window_bounds = array<i64: 8, 8, 32>}, {pipeline_mode = #tpu.pipeline_mode<synchronous>, transform_indices = @transform_2, window_bounds = array<i64: 32, 64>}, {pipeline_mode = #tpu.pipeline_mode<synchronous>, transform_indices = @transform_3, window_bounds = array<i64: 1, 64>}, {pipeline_mode = #tpu.pipeline_mode<synchronous>, transform_indices = @transform_4, window_bounds = array<i64: 32, 32>}, {pipeline_mode = #tpu.pipeline_mode<synchronous>, transform_indices = @transform_5, window_bounds = array<i64: 1, 32>}, {transform_indices = @transform_6, window_bounds = array<i64: 8, 32>}]} {
    %c0_i32 = arith.constant 0 : i32
    %0 = arith.cmpi eq, %arg1, %c0_i32 : i32
    %1 = arith.extui %0 : i1 to i32
    %c0_i32_0 = arith.constant 0 : i32
    %2 = arith.cmpi ne, %1, %c0_i32_0 : i32
    scf.if %2 {
      %cst_28 = arith.constant -1.000000e+30 : f32
      %45 = vector.broadcast %cst_28 : f32 to vector<8x32xf32>
      %c0_29 = arith.constant 0 : index
      %c0_30 = arith.constant 0 : index
      %46 = vector.load %arg9[%c0_29, %c0_30] : memref<8x32xf32, #tpu.memory_space<vmem>>, vector<8x32xf32>
      tpu.vector_store %arg9[%c0_29, %c0_30], %45 {strides = array<i32>} : memref<8x32xf32, #tpu.memory_space<vmem>>, vector<8x32xf32>,
      %cst_31 = arith.constant 0.000000e+00 : f32
      %47 = vector.broadcast %cst_31 : f32 to vector<8x32xf32>
      %c0_32 = arith.constant 0 : index
      %c0_33 = arith.constant 0 : index
      %48 = vector.load %arg10[%c0_32, %c0_33] : memref<8x32xf32, #tpu.memory_space<vmem>>, vector<8x32xf32>
      tpu.vector_store %arg10[%c0_32, %c0_33], %47 {strides = array<i32>} : memref<8x32xf32, #tpu.memory_space<vmem>>, vector<8x32xf32>,
      %cst_34 = arith.constant 0.000000e+00 : f32
      %49 = vector.broadcast %cst_34 : f32 to vector<8x32xf32>
      %c0_35 = arith.constant 0 : index
      %c0_36 = arith.constant 0 : index
      %50 = vector.load %arg11[%c0_35, %c0_36] : memref<8x32xf32, #tpu.memory_space<vmem>>, vector<8x32xf32>
      tpu.vector_store %arg11[%c0_35, %c0_36], %49 {strides = array<i32>} : memref<8x32xf32, #tpu.memory_space<vmem>>, vector<8x32xf32>,
    } else {
    }
    %c0 = arith.constant 0 : index
    %c0_1 = arith.constant 0 : index
    %c0_2 = arith.constant 0 : index
    %3 = vector.load %arg2[%c0, %c0_1, %c0_2] : memref<8x8x32xf32, #tpu.memory_space<vmem>>, vector<8x8x32xf32>
    %4 = vector.shape_cast %3 : vector<8x8x32xf32> to vector<64x32xf32>
    %c0_3 = arith.constant 0 : index
    %c0_4 = arith.constant 0 : index
    %5 = vector.load %arg4[%c0_3, %c0_4] : memref<32x64xf32, #tpu.memory_space<vmem>>, vector<32x64xf32>
    %c0_5 = arith.constant 0 : index
    %c0_6 = arith.constant 0 : index
    %6 = vector.load %arg5[%c0_5, %c0_6] : memref<1x64xf32, #tpu.memory_space<vmem>>, vector<1x64xf32>
    %c0_7 = arith.constant 0 : index
    %c0_8 = arith.constant 0 : index
    %c0_9 = arith.constant 0 : index
    %7 = vector.load %arg3[%c0_7, %c0_8, %c0_9] : memref<8x8x32xf32, #tpu.memory_space<vmem>>, vector<8x8x32xf32>
    %8 = vector.shape_cast %7 : vector<8x8x32xf32> to vector<64x32xf32>
    %9 = vector.extract_strided_slice %5 {offsets = [0, 0], sizes = [32, 32], strides = [1, 1]} : vector<32x64xf32> to vector<32x32xf32>
    %cst = arith.constant dense<0.000000e+00> : vector<64x32xf32>
    %10 = tpu.matmul %4, %9, %cst {dimension_numbers = #tpu.dot_dimension_numbers<[1], [0], [0], [1], [0, 0, 1, 1], [], []>} : vector<64x32xf32>, vector<32x32xf32>, vector<64x32xf32> -> vector<64x32xf32>
    %11 = vector.extract_strided_slice %6 {offsets = [0, 0], sizes = [1, 32], strides = [1, 1]} : vector<1x64xf32> to vector<1x32xf32>
    %12 = vector.broadcast %11 : vector<1x32xf32> to vector<64x32xf32>
    %13 = arith.addf %10, %12 : vector<64x32xf32>
    %14 = vector.shape_cast %13 : vector<64x32xf32> to vector<8x8x32xf32>
    %15 = vector.extract_strided_slice %5 {offsets = [0, 32], sizes = [32, 32], strides = [1, 1]} : vector<32x64xf32> to vector<32x32xf32>
    %cst_10 = arith.constant dense<0.000000e+00> : vector<64x32xf32>
    %16 = tpu.matmul %8, %15, %cst_10 {dimension_numbers = #tpu.dot_dimension_numbers<[1], [0], [0], [1], [0, 0, 1, 1], [], []>} : vector<64x32xf32>, vector<32x32xf32>, vector<64x32xf32> -> vector<64x32xf32>
    %17 = vector.extract_strided_slice %6 {offsets = [0, 32], sizes = [1, 32], strides = [1, 1]} : vector<1x64xf32> to vector<1x32xf32>
    %18 = vector.broadcast %17 : vector<1x32xf32> to vector<64x32xf32>
    %19 = arith.addf %16, %18 : vector<64x32xf32>
    %20 = vector.shape_cast %19 : vector<64x32xf32> to vector<8x8x32xf32>
    %c0_11 = arith.constant 0 : index
    %c0_12 = arith.constant 0 : index
    %21 = vector.load %arg9[%c0_11, %c0_12] : memref<8x32xf32, #tpu.memory_space<vmem>>, vector<8x32xf32>
    %cst_13 = arith.constant dense<0xFF800000> : vector<8x32xf32>
    %22 = vector.multi_reduction <maximumf>, %14, %cst_13 [0] : vector<8x8x32xf32> to vector<8x32xf32>
    %23 = arith.maximumf %21, %22 : vector<8x32xf32>
    %24 = vector.shape_cast %23 : vector<8x32xf32> to vector<1x8x32xf32>
    %25 = vector.broadcast %24 : vector<1x8x32xf32> to vector<8x8x32xf32>
    %26 = arith.subf %14, %25 : vector<8x8x32xf32>
    %27 = math.exp %26 : vector<8x8x32xf32>
    %28 = arith.subf %21, %23 : vector<8x32xf32>
    %29 = math.exp %28 : vector<8x32xf32>
    %c0_14 = arith.constant 0 : index
    %c0_15 = arith.constant 0 : index
    %30 = vector.load %arg10[%c0_14, %c0_15] : memref<8x32xf32, #tpu.memory_space<vmem>>, vector<8x32xf32>
    %31 = arith.mulf %29, %30 : vector<8x32xf32>
    %cst_16 = arith.constant dense<0.000000e+00> : vector<8x32xf32>
    %32 = vector.multi_reduction <add>, %27, %cst_16 [0] : vector<8x8x32xf32> to vector<8x32xf32>
    %33 = arith.addf %31, %32 : vector<8x32xf32>
    %c0_17 = arith.constant 0 : index
    %c0_18 = arith.constant 0 : index
    %34 = vector.load %arg10[%c0_17, %c0_18] : memref<8x32xf32, #tpu.memory_space<vmem>>, vector<8x32xf32>
    tpu.vector_store %arg10[%c0_17, %c0_18], %33 {strides = array<i32>} : memref<8x32xf32, #tpu.memory_space<vmem>>, vector<8x32xf32>,
    %c0_19 = arith.constant 0 : index
    %c0_20 = arith.constant 0 : index
    %35 = vector.load %arg11[%c0_19, %c0_20] : memref<8x32xf32, #tpu.memory_space<vmem>>, vector<8x32xf32>
    %36 = arith.mulf %29, %35 : vector<8x32xf32>
    %37 = arith.mulf %27, %20 : vector<8x8x32xf32>
    %cst_21 = arith.constant dense<0.000000e+00> : vector<8x32xf32>
    %38 = vector.multi_reduction <add>, %37, %cst_21 [0] : vector<8x8x32xf32> to vector<8x32xf32>
    %39 = arith.addf %36, %38 : vector<8x32xf32>
    %c0_22 = arith.constant 0 : index
    %c0_23 = arith.constant 0 : index
    %40 = vector.load %arg11[%c0_22, %c0_23] : memref<8x32xf32, #tpu.memory_space<vmem>>, vector<8x32xf32>
    tpu.vector_store %arg11[%c0_22, %c0_23], %39 {strides = array<i32>} : memref<8x32xf32, #tpu.memory_space<vmem>>, vector<8x32xf32>,
    %c0_24 = arith.constant 0 : index
    %c0_25 = arith.constant 0 : index
    %41 = vector.load %arg9[%c0_24, %c0_25] : memref<8x32xf32, #tpu.memory_space<vmem>>, vector<8x32xf32>
    tpu.vector_store %arg9[%c0_24, %c0_25], %23 {strides = array<i32>} : memref<8x32xf32, #tpu.memory_space<vmem>>, vector<8x32xf32>,
    %c0_i32_26 = arith.constant 0 : i32
    %42 = arith.cmpi eq, %arg1, %c0_i32_26 : i32
    %43 = arith.extui %42 : i1 to i32
    %c0_i32_27 = arith.constant 0 : i32
    %44 = arith.cmpi ne, %43, %c0_i32_27 : i32
    scf.if %44 {
      %c0_28 = arith.constant 0 : index
      %c0_29 = arith.constant 0 : index
      %45 = vector.load %arg11[%c0_28, %c0_29] : memref<8x32xf32, #tpu.memory_space<vmem>>, vector<8x32xf32>
      %c0_30 = arith.constant 0 : index
      %c0_31 = arith.constant 0 : index
      %46 = vector.load %arg10[%c0_30, %c0_31] : memref<8x32xf32, #tpu.memory_space<vmem>>, vector<8x32xf32>
      %47 = tpu.reciprocal %46 : vector<8x32xf32> -> vector<8x32xf32>
      %48 = arith.mulf %45, %47 : vector<8x32xf32>
      %c0_32 = arith.constant 0 : index
      %c0_33 = arith.constant 0 : index
      %49 = vector.load %arg6[%c0_32, %c0_33] : memref<32x32xf32, #tpu.memory_space<vmem>>, vector<32x32xf32>
      %cst_34 = arith.constant dense<0.000000e+00> : vector<8x32xf32>
      %50 = tpu.matmul %48, %49, %cst_34 {dimension_numbers = #tpu.dot_dimension_numbers<[1], [0], [0], [1], [0, 0, 1, 1], [], []>} : vector<8x32xf32>, vector<32x32xf32>, vector<8x32xf32> -> vector<8x32xf32>
      %c0_35 = arith.constant 0 : index
      %c0_36 = arith.constant 0 : index
      %51 = vector.load %arg7[%c0_35, %c0_36] : memref<1x32xf32, #tpu.memory_space<vmem>>, vector<1x32xf32>
      %52 = vector.broadcast %51 : vector<1x32xf32> to vector<8x32xf32>
      %53 = arith.addf %50, %52 : vector<8x32xf32>
      %c0_37 = arith.constant 0 : index
      %c0_38 = arith.constant 0 : index
      %54 = vector.load %arg8[%c0_37, %c0_38] : memref<8x32xf32, #tpu.memory_space<vmem>>, vector<8x32xf32>
      tpu.vector_store %arg8[%c0_37, %c0_38], %53 {strides = array<i32>} : memref<8x32xf32, #tpu.memory_space<vmem>>, vector<8x32xf32>,
    } else {
    }
    return
  }
  func.func @transform_0(%arg0: i32, %arg1: i32) -> (i32, i32, i32) {
    %c0_i32 = arith.constant 0 : i32
    %c0_i32_0 = arith.constant 0 : i32
    return %arg1, %arg0, %c0_i32 : i32, i32, i32
  }
  func.func @transform_1(%arg0: i32, %arg1: i32) -> (i32, i32, i32) {
    %c0_i32 = arith.constant 0 : i32
    %c0_i32_0 = arith.constant 0 : i32
    return %arg1, %arg0, %c0_i32 : i32, i32, i32
  }
  func.func @transform_2(%arg0: i32, %arg1: i32) -> (i32, i32) {
    %c0_i32 = arith.constant 0 : i32
    %c0_i32_0 = arith.constant 0 : i32
    %c0_i32_1 = arith.constant 0 : i32
    return %c0_i32, %c0_i32_0 : i32, i32
  }
  func.func @transform_3(%arg0: i32, %arg1: i32) -> (i32, i32) {
    %c0_i32 = arith.constant 0 : i32
    %c0_i32_0 = arith.constant 0 : i32
    %c0_i32_1 = arith.constant 0 : i32
    return %c0_i32, %c0_i32_0 : i32, i32
  }
  func.func @transform_4(%arg0: i32, %arg1: i32) -> (i32, i32) {
    %c0_i32 = arith.constant 0 : i32
    %c0_i32_0 = arith.constant 0 : i32
    %c0_i32_1 = arith.constant 0 : i32
    return %c0_i32, %c0_i32_0 : i32, i32
  }
  func.func @transform_5(%arg0: i32, %arg1: i32) -> (i32, i32) {
    %c0_i32 = arith.constant 0 : i32
    %c0_i32_0 = arith.constant 0 : i32
    %c0_i32_1 = arith.constant 0 : i32
    return %c0_i32, %c0_i32_0 : i32, i32
  }
  func.func @transform_6(%arg0: i32, %arg1: i32) -> (i32, i32) {
    %c0_i32 = arith.constant 0 : i32
    %c0_i32_0 = arith.constant 0 : i32
    return %arg0, %c0_i32 : i32, i32
  }
}

</mosaic_0001>

<bundles_post_ra>
// kernel: tpu_custom_call.1
= control target key start
LH: loop header
LB: loop body
LE: loop exit
PB: predicated region body
PF: predicated region fallthrough
CT: control target
= control target key end

     0   :  { %11 = vsyncpa [#allocation6], 0  ;;  %s968_s0 = inlined_call_operand.hbm [shape: f32[8,8,32], index: 0, kind: input, shape index: {}]   ;;  %s969_s1 = inlined_call_operand.hbm [shape: f32[8,8,32], index: 1, kind: input, shape index: {}]   ;;  %s970_s2 = inlined_call_operand.hbm [shape: f32[32,64], index: 2, kind: input, shape index: {}]   ;;  %s971_s3 = inlined_call_operand.vmem [shape: f32[1,64], index: 3, kind: input, shape index: {}]   ;;  %s972_s4 = inlined_call_operand.hbm [shape: f32[32,32], index: 4, kind: input, shape index: {}]   ;;  %s973_s5 = inlined_call_operand.vmem [shape: f32[1,32], index: 5, kind: input, shape index: {}]   ;;  %s974_s6 = inlined_call_operand.hbm [shape: f32[8,32], index: 6, kind: output, shape index: {}]  }
   0x1   :  { %12 = vsyncpa [#allocation9], 0 }
   0x2   :  { %13 = vsyncpa [#allocation12], 0 }
   0x3   :  { %14 = vsyncpa [#allocation7], 0  ;;  %s830_s21 = smov [#allocation8]   ;;  %s831_s23 = smov [#allocation5]  }
   0x4   :  { %s32_s22 = sshll.u32 %s830_s21, 4  ;;  %s20_s24 = sshll.u32 %s831_s23, 4  ;;  %s33_s22 = int_to_ptr.vmem [resolvable:$true] %s32_s22  ;;  %s21_s24 = int_to_ptr.vmem [resolvable:$true] %s20_s24 }
   0x5   :  { %s730_s25 = scalar_lea.vmem %s33_s22, 1024  ;;  %p735_p1 = scmp.lt.s32.totalorder %s33_s22, %s33_s22 }
   0x6   :  { %p731_p0 = scmp.ne.s32.totalorder %s33_s22, %s730_s25  ;;  %p736_p2 = scmp.lt.s32.totalorder %s730_s25, %s730_s25 }
   0x8   :  { %p737_p3 = por %p736_p2, %p735_p1 }
   0xa   :  { %p738_p4 = pnand %p737_p3, %p731_p0 }
   0xc   :  { %741 = shalt.err (!%p738_p4)
}
   0xd   :  { %s832_s26 = smov 128   ;;  %s833_s27 = smov 8  }
   0xe   :  { %38 = dma.hbm_to_vmem [thread:$0]  %s969_s1, 1024, %s33_s22, [#allocation9], %s832_s26, %s832_s26, %s833_s27  }
   0xf   :  { %s750_s30 = scalar_lea.vmem %s21_s24, 1024  ;;  %p755_p6 = scmp.lt.s32.totalorder %s21_s24, %s21_s24 }
  0x10   :  { %p751_p5 = scmp.ne.s32.totalorder %s21_s24, %s750_s30  ;;  %p756_p7 = scmp.lt.s32.totalorder %s750_s30, %s750_s30 }
  0x12   :  { %p757_p8 = por %p756_p7, %p755_p6 }
  0x14   :  { %p758_p9 = pnand %p757_p8, %p751_p5 }
  0x16   :  { %761 = shalt.err (!%p758_p9)
}
  0x17   :  { %26 = dma.hbm_to_vmem [thread:$0]  %s968_s0, 1024, %s21_s24, [#allocation6], %s832_s26, %s832_s26, %s833_s27  }
  0x18   :  { %s834_s9 = smov [#allocation10]   ;;  %s835_s11 = smov [#allocation11]  }
  0x19   :  { %s44_s10 = sshll.u32 %s834_s9, 4  ;;  %s58_s12 = sshll.u32 %s835_s11, 4  ;;  %s45_s10 = int_to_ptr.vmem [resolvable:$true] %s44_s10  ;;  %s59_s12 = int_to_ptr.vmem [resolvable:$true] %s58_s12 }
  0x1a   :  { %s770_s1 = scalar_lea.vmem %s45_s10, 512  ;;  %p775_p11 = scmp.lt.s32.totalorder %s45_s10, %s45_s10 }
  0x1b   :  { %p771_p10 = scmp.ne.s32.totalorder %s45_s10, %s770_s1  ;;  %p776_p12 = scmp.lt.s32.totalorder %s770_s1, %s770_s1 }
  0x1d   :  { %p777_p13 = por %p776_p12, %p775_p11 }
  0x1f   :  { %p778_p0 = pnand %p777_p13, %p771_p10 }
  0x21   :  { %781 = shalt.err (!%p778_p0)
}
  0x22   :  { %50 = dma.hbm_to_vmem [thread:$0]  %s970_s2, 512, %s45_s10, [#allocation9], %s832_s26, %s832_s26, %s833_s27  }
  0x23   :  { %s790_s0 = scalar_lea.vmem %s59_s12, 512  ;;  %p795_p2 = scmp.lt.s32.totalorder %s59_s12, %s59_s12 }
  0x24   :  { %p791_p1 = scmp.ne.s32.totalorder %s59_s12, %s790_s0  ;;  %p796_p3 = scmp.lt.s32.totalorder %s790_s0, %s790_s0 }
  0x26   :  { %p797_p4 = por %p796_p3, %p795_p2 }
  0x28   :  { %p798_p5 = pnand %p797_p4, %p791_p1 }
  0x2a   :  { %801 = shalt.err (!%p798_p5)
}
  0x2b   :  { %64 = dma.hbm_to_vmem [thread:$0]  %s972_s4, 512, %s59_s12, [#allocation12], %s832_s26, %s832_s26, %s833_s27  }
  0x2c   :  { %822 = dma.done.wait [#allocation6], 1024  }
  0x2d   :  { %823 = vsyncadd [#allocation6], 4294966272 }
  0x2e   :  { %824 = dma.done.wait [#allocation9], 1536  }
  0x2f   :  { %825 = vsyncadd [#allocation9], 4294965760 }
  0x30   :  { %826 = dma.done.wait [#allocation12], 512  }
  0x31   :  { %827 = vsyncadd [#allocation12], 4294966784  ;;  %vm83_vm0 = vcmask 261120   ;;  %v98_v0 = vld [vmem:[#allocation10 + $0x18] sm:$0xff]  ;;  %v96_v1 = vld [vmem:[#allocation10 + $0x8] sm:$0xff]  ;;  %s836_s2 = smov 96  }
  0x32   :  { %254 = vrot.lane.b32.xlu0 %v98_v0, %s836_s2  ;;  %250 = vrot.lane.b32.xlu1 %v96_v1, %s836_s2  ;;  %v87_v2 = vld [vmem:[#allocation5] sm:$0xff]  ;;  %v97_v3 = vld [vmem:[#allocation10 + $0x10] sm:$0xff]  ;;  %v88_v6 = vld [vmem:[#allocation5 + $0x8] sm:$0xff]  ;;  %v837_v14 = vmov -1e+30   ;;  %v838_v26 = vmov 0.0  }
  0x33   :  { %v95_v4 = vld [vmem:[#allocation10] sm:$0xff]  ;;  %640 = vmatprep.subr.mxu0 %v98_v0  ;;  %648 = vmatprep.mubr.msk.f32.mxu0 %vm83_vm0, %v87_v2  ;;  %v89_v7 = vld [vmem:[#allocation5 + $0x10] sm:$0xff]  ;;  %v905_v8 = vld [vmem:[%s971_s3] ss:$0 sm:$0xff]  ;;  %84 = vst.msk [vmem:[#allocation2] sm:$0xff] %vm83_vm0, %v837_v14  ;;  %vm839_vm1 = vmmov 0  }
  0x34   :  { %641 = vmatpush3.msra.mxu0 %v98_v0  ;;  %v100_v5 = vld [vmem:[#allocation8] sm:$0xff]  ;;  %v90_v9 = vld [vmem:[#allocation5 + $0x18] sm:$0xff]  ;;  %v92_v11 = vld [vmem:[#allocation5 + $0x28] sm:$0xff]  ;;  %85 = vst.msk [vmem:[#allocation3] sm:$0xff] %vm83_vm0, %v838_v26  ;;  %s840_s19 = smov [#allocation13]  }
  0x35   :  { %642 = vmatprep.subr.mxu0 %v97_v3  ;;  %668 = vmatprep.mubr.msk.f32.mxu1 %vm83_vm0, %v100_v5  ;;  %v91_v10 = vld [vmem:[#allocation5 + $0x20] sm:$0xff]  ;;  %v93_v12 = vld [vmem:[#allocation5 + $0x30] sm:$0xff]  ;;  %v94_v13 = vld [vmem:[#allocation5 + $0x38] sm:$0xff]  ;;  %86 = vst.msk [vmem:[#allocation4] sm:$0xff] %vm83_vm0, %v838_v26  ;;  %s581_s20 = sshll.u32 %s840_s19, 4  ;;  %s582_s20 = int_to_ptr.vmem [resolvable:$true] %s581_s20 }
  0x36   :  { %252 = vrot.lane.b32.xlu0 %v97_v3, %s836_s2  ;;  %248 = vrot.lane.b32.xlu1 %v95_v4, %s836_s2  ;;  %v101_v19 = vld [vmem:[#allocation8 + $0x8] sm:$0xff]  ;;  %v102_v20 = vld [vmem:[#allocation8 + $0x10] sm:$0xff]  ;;  %v103_v21 = vld [vmem:[#allocation8 + $0x18] sm:$0xff]  ;;  %s802_s21 = scalar_lea.vmem %s582_s20, 128  ;;  %p807_p7 = scmp.lt.s32.totalorder %s582_s20, %s582_s20 }
  0x37   :  { %643 = vmatpush3.msra.mxu0 %v97_v3  ;;  %v104_v22 = vld [vmem:[#allocation8 + $0x20] sm:$0xff]  ;;  %v105_v23 = vld [vmem:[#allocation8 + $0x28] sm:$0xff]  ;;  %v106_v24 = vld [vmem:[#allocation8 + $0x30] sm:$0xff]  ;;  %p803_p6 = scmp.ne.s32.totalorder %s582_s20, %s802_s21  ;;  %p808_p8 = scmp.lt.s32.totalorder %s802_s21, %s802_s21 }
  0x38   :  { %644 = vmatprep.subr.mxu0 %v96_v1  ;;  %v107_v25 = vld [vmem:[#allocation8 + $0x38] sm:$0xff]  ;;  %v492_v47 = vld [vmem:[#allocation11 + $0x10] sm:$0xff]  ;;  %v491_v54 = vld [vmem:[#allocation11 + $0x8] sm:$0xff] }
  0x39   :  { %645 = vmatpush3.msra.mxu0 %v96_v1  ;;  %v493_v46 = vld [vmem:[#allocation11 + $0x18] sm:$0xff]  ;;  %v490_v57 = vld [vmem:[#allocation11] sm:$0xff]  ;;  %p809_p9 = por %p808_p8, %p807_p7 }
  0x3a   :  { %646 = vmatprep.subr.mxu0 %v95_v4  ;;  %260 = vrot.lane.b32.xlu0 %v905_v8, %s836_s2  ;;  %v392_v61 = vld [vmem:[#allocation2] sm:$0xff] }
  0x3b   :  { %647 = vmatpush3.msra.mxu0 %v95_v4  ;;  %p810_p10 = pnand %p809_p9, %p803_p6 }
  0x3c   :  { %649 = vmatmul.mubr.msk.f32.vlgmr.msra.gmra.mxu0 %vm83_vm0, %v88_v6  ;;  %680 = vmatprep.subr.mxu0 %v838_v26 }
  0x3d   :  { %651 = vmatprep.mubr.msk.f32.mxu0 %vm83_vm0, %v89_v7  ;;  %681 = vmatpush3.msra.mxu0 %v493_v46 }
  0x3e   :  { %682 = vmatprep.subr.mxu0 %v838_v26 }
  0x3f   :  { %683 = vmatpush3.msra.mxu0 %v492_v47 }
  0x40   :  { %652 = vmatmul.mubr.msk.f32.gmra.mxu0 %vm83_vm0, %v90_v9  ;;  %684 = vmatprep.subr.mxu0 %v838_v26 }
  0x41   :  { %654 = vmatprep.mubr.msk.f32.mxu0 %vm83_vm0, %v91_v10  ;;  %685 = vmatpush3.msra.mxu0 %v491_v54 }
  0x42   :  { %686 = vmatprep.subr.mxu0 %v838_v26 }
  0x43   :  { %687 = vmatpush3.msra.mxu0 %v490_v57 }
  0x44   :  { %655 = vmatmul.mubr.msk.f32.gmra.mxu0 %vm83_vm0, %v92_v11 }
  0x45   :  { %657 = vmatprep.mubr.msk.f32.mxu0 %vm83_vm0, %v93_v12 }
  0x48   :  { %658 = vmatmul.mubr.msk.f32.gmra.mxu0 %vm83_vm0, %v94_v13 }
  0x49   :  { %688 = vmatprep.mubr.msk.f32.mxu0 %vm839_vm1, %v838_v26 }
  0xa4   :  { %v255_v15 = vpop.permute.xlu0 %254  ;;  %v251_v16 = vpop.permute.xlu1 %250 }
  0xa5   :  { %660 = vmatprep.subr.mxu1 %v255_v15 }
  0xa6   :  { %661 = vmatpush3.msra.mxu1 %v255_v15 }
  0xa8   :  { %v253_v17 = vpop.permute.xlu0 %252  ;;  %v249_v18 = vpop.permute.xlu1 %248 }
  0xa9   :  { %662 = vmatprep.subr.mxu1 %v253_v17 }
  0xaa   :  { %663 = vmatpush3.msra.mxu1 %v253_v17 }
  0xab   :  { %664 = vmatprep.subr.mxu1 %v251_v16 }
  0xac   :  { %665 = vmatpush3.msra.mxu1 %v251_v16 }
  0xad   :  { %666 = vmatprep.subr.mxu1 %v249_v18 }
  0xae   :  { %667 = vmatpush3.msra.mxu1 %v249_v18 }
  0xaf   :  { %669 = vmatmul.mubr.msk.f32.vlgmr.msra.gmra.mxu1 %vm83_vm0, %v101_v19 }
  0xb0   :  { %671 = vmatprep.mubr.msk.f32.mxu1 %vm83_vm0, %v102_v20 }
  0xb3   :  { %672 = vmatmul.mubr.msk.f32.gmra.mxu1 %vm83_vm0, %v103_v21 }
  0xb4   :  { %674 = vmatprep.mubr.msk.f32.mxu1 %vm83_vm0, %v104_v22 }
  0xb7   :  { %675 = vmatmul.mubr.msk.f32.gmra.mxu1 %vm83_vm0, %v105_v23 }
  0xb8   :  { %677 = vmatprep.mubr.msk.f32.mxu1 %vm83_vm0, %v106_v24 }
  0xbb   :  { %678 = vmatmul.mubr.msk.f32.gmra.mxu1 %vm83_vm0, %v107_v25 }
  0xfc   :  { %v650_v27 = vpop.f32.mrf.mxu0 }
  0xfd   :  { %v211_v30 = vadd.f32 %v650_v27, %v905_v8 }
  0xfe   :  { %v205_v28 = vpop.f32.mrf.mxu0 }
  0xff   :  { %v206_v32 = vadd.f32 %v905_v8, %v205_v28  ;;  %v394_v36 = vsel %vm83_vm0, %v211_v30, -inf }
 0x100   :  { %v653_v29 = vpop.f32.mrf.mxu0 }
 0x101   :  { %v221_v34 = vadd.f32 %v653_v29, %v905_v8  ;;  %v393_v38 = vsel %vm83_vm0, %v206_v32, -inf }
 0x102   :  { %v215_v31 = vpop.f32.mrf.mxu0 }
 0x103   :  { %v216_v39 = vadd.f32 %v905_v8, %v215_v31  ;;  %v396_v43 = vsel %vm83_vm0, %v221_v34, -inf }
 0x104   :  { %v656_v33 = vpop.f32.mrf.mxu0 }
 0x105   :  { %v231_v35 = vadd.f32 %v656_v33, %v905_v8  ;;  %v395_v51 = vsel %vm83_vm0, %v216_v39, -inf }
 0x106   :  { %v225_v37 = vpop.f32.mrf.mxu0 }
 0x107   :  { %v399_v40 = vsel %vm83_vm0, %v231_v35, -inf  ;;  %v226_v41 = vadd.f32 %v905_v8, %v225_v37 }
 0x108   :  { %v659_v42 = vpop.f32.mrf.mxu0  ;;  %v400_v48 = vmax.f32 %v394_v36, %v399_v40 }
 0x109   :  { %v397_v44 = vsel %vm83_vm0, %v226_v41, -inf  ;;  %v241_v45 = vadd.f32 %v659_v42, %v905_v8 }
 0x10a   :  { %v398_v49 = vmax.f32 %v393_v38, %v397_v44  ;;  %v235_v50 = vpop.f32.mrf.mxu0  ;;  %v436_v38 = vld [vmem:[#allocation3] sm:$0xff] }
 0x10b   :  { %v403_v52 = vsel %vm83_vm0, %v241_v45, -inf  ;;  %v236_v53 = vadd.f32 %v905_v8, %v235_v50 }
 0x10c   :  { %v404_v55 = vmax.f32 %v396_v43, %v403_v52  ;;  %v405_v58 = vmax.f32 %v398_v49, %v400_v48 }
 0x10d   :  { %v401_v56 = vsel %vm83_vm0, %v236_v53, -inf }
 0x10e   :  { %v402_v59 = vmax.f32 %v395_v51, %v401_v56 }
 0x110   :  { %v406_v60 = vmax.f32 %v402_v59, %v404_v55 }
 0x112   :  { %v407_v62 = vmax.f32 %v405_v58, %v406_v60 }
 0x114   :  { %v408_v63 = vmax.f32 %v392_v61, %v407_v62 }
 0x116   :  { %482 = vst.msk [vmem:[#allocation2] sm:$0xff] %vm83_vm0, %v408_v63  ;;  %v410_v0 = vsub.f32 %v211_v30, %v408_v63  ;;  %v409_v1 = vsub.f32 %v206_v32, %v408_v63  ;;  %v412_v2 = vsub.f32 %v221_v34, %v408_v63  ;;  %v411_v3 = vsub.f32 %v216_v39, %v408_v63 }
 0x117   :  { %v414_v5 = vsub.f32 %v231_v35, %v408_v63  ;;  %v413_v7 = vsub.f32 %v226_v41, %v408_v63  ;;  %v415_v9 = vsub.f32 %v236_v53, %v408_v63  ;;  %v416_v13 = vsub.f32 %v241_v45, %v408_v63  ;;  %v261_v45 = vpop.permute.xlu0 %260 }
 0x118   :  { %v419_v4 = vmul.f32 1.442695, %v410_v0  ;;  %v417_v6 = vmul.f32 1.442695, %v409_v1  ;;  %v423_v8 = vmul.f32 1.442695, %v412_v2  ;;  %v433_v14 = vsub.f32 %v392_v61, %v408_v63 }
 0x119   :  { %v421_v10 = vmul.f32 1.442695, %v411_v3  ;;  %v427_v11 = vmul.f32 1.442695, %v414_v5  ;;  %v425_v12 = vmul.f32 1.442695, %v413_v7 }
 0x11a   :  { %702 = vpow2.f32 %v419_v4  ;;  %v429_v15 = vmul.f32 1.442695, %v415_v9  ;;  %v431_v16 = vmul.f32 1.442695, %v416_v13  ;;  %v434_v17 = vmul.f32 1.442695, %v433_v14 }
 0x11b   :  { %704 = vpow2.f32 %v417_v6 }
 0x11c   :  { %706 = vpow2.f32 %v423_v8 }
 0x11d   :  { %708 = vpow2.f32 %v421_v10 }
 0x11e   :  { %710 = vpow2.f32 %v427_v11 }
 0x11f   :  { %712 = vpow2.f32 %v425_v12 }
 0x120   :  { %714 = vpow2.f32 %v429_v15 }
 0x121   :  { %716 = vpow2.f32 %v431_v16 }
 0x122   :  { %718 = vpow2.f32 %v434_v17 }
 0x127   :  { %v703_v18 = vpop.eup %702 }
 0x128   :  { %v705_v19 = vpop.eup %704  ;;  %v439_v20 = vsel %vm83_vm0, %v703_v18, 0.0 }
 0x129   :  { %v707_v21 = vpop.eup %706  ;;  %v438_v22 = vsel %vm83_vm0, %v705_v19, 0.0 }
 0x12a   :  { %v709_v23 = vpop.eup %708  ;;  %v440_v24 = vadd.f32 %v439_v20, %v438_v22  ;;  %v443_v26 = vsel %vm83_vm0, %v707_v21, 0.0 }
 0x12b   :  { %v711_v25 = vpop.eup %710  ;;  %v441_v27 = vsel %vm83_vm0, %v709_v23, 0.0 }
 0x12c   :  { %v713_v28 = vpop.eup %712  ;;  %v442_v29 = vadd.f32 %v441_v27, %v440_v24  ;;  %v447_v33 = vsel %vm83_vm0, %v711_v25, 0.0 }
 0x12d   :  { %v445_v30 = vsel %vm83_vm0, %v713_v28, 0.0  ;;  %v715_v31 = vpop.eup %714 }
 0x12e   :  { %v444_v32 = vadd.f32 %v443_v26, %v442_v29  ;;  %v717_v34 = vpop.eup %716  ;;  %v449_v37 = vsel %vm83_vm0, %v715_v31, 0.0 }
 0x12f   :  { %v719_v36 = vpop.eup %718  ;;  %v451_v40 = vsel %vm83_vm0, %v717_v34, 0.0 }
 0x130   :  { %v446_v35 = vadd.f32 %v445_v30, %v444_v32  ;;  %v437_v42 = vmul.f32 %v719_v36, %v436_v38 }
 0x132   :  { %v448_v39 = vadd.f32 %v447_v33, %v446_v35 }
 0x134   :  { %v450_v41 = vadd.f32 %v449_v37, %v448_v39 }
 0x136   :  { %v452_v43 = vadd.f32 %v451_v40, %v450_v41 }
 0x138   :  { %v453_v44 = vadd.f32 %v452_v43, %v437_v42 }
 0x13a   :  { %454 = vst.msk [vmem:[#allocation3] sm:$0xff] %vm83_vm0, %v453_v44 }
 0x141   :  { %v487_v16 = vld [vmem:[#allocation3] sm:$0xff] }
 0x142   :  { %720 = vrcp.f32 %v487_v16 }
 0x16f   :  { %v670_v46 = vpop.f32.mrf.mxu1 }
 0x170   :  { %v359_v47 = vadd.f32 %v670_v46, %v261_v45 }
 0x171   :  { %v353_v48 = vpop.f32.mrf.mxu1 }
 0x172   :  { %v354_v49 = vadd.f32 %v353_v48, %v261_v45  ;;  %v458_v51 = vmul.f32 %v703_v18, %v359_v47  ;;  %v455_v18 = vld [vmem:[#allocation4] sm:$0xff] }
 0x173   :  { %v673_v50 = vpop.f32.mrf.mxu1  ;;  %v456_v22 = vmul.f32 %v719_v36, %v455_v18 }
 0x174   :  { %v457_v52 = vmul.f32 %v705_v19, %v354_v49  ;;  %v369_v53 = vadd.f32 %v673_v50, %v261_v45  ;;  %v466_v58 = vsel %vm83_vm0, %v458_v51, 0.0 }
 0x175   :  { %v363_v54 = vpop.f32.mrf.mxu1 }
 0x176   :  { %v465_v55 = vsel %vm83_vm0, %v457_v52, 0.0  ;;  %v364_v56 = vadd.f32 %v363_v54, %v261_v45  ;;  %v460_v59 = vmul.f32 %v707_v21, %v369_v53 }
 0x177   :  { %v676_v57 = vpop.f32.mrf.mxu1  ;;  %v467_v62 = vadd.f32 %v466_v58, %v465_v55 }
 0x178   :  { %v459_v60 = vmul.f32 %v709_v23, %v364_v56  ;;  %v379_v61 = vadd.f32 %v676_v57, %v261_v45  ;;  %v470_v4 = vsel %vm83_vm0, %v460_v59, 0.0 }
 0x179   :  { %v373_v63 = vpop.f32.mrf.mxu1 }
 0x17a   :  { %v468_v0 = vsel %vm83_vm0, %v459_v60, 0.0  ;;  %v374_v1 = vadd.f32 %v373_v63, %v261_v45  ;;  %v462_v5 = vmul.f32 %v711_v25, %v379_v61  ;;  %v721_v25 = vpop.eup %720 }
 0x17b   :  { %v469_v2 = vadd.f32 %v468_v0, %v467_v62  ;;  %v679_v3 = vpop.f32.mrf.mxu1 }
 0x17c   :  { %v461_v6 = vmul.f32 %v713_v28, %v374_v1  ;;  %v389_v7 = vadd.f32 %v679_v3, %v261_v45  ;;  %v474_v13 = vsel %vm83_vm0, %v462_v5, 0.0  ;;  %v609_v28 = vld [vmem:[%s973_s5] ss:$0 sm:$0xff] }
 0x17d   :  { %v471_v8 = vadd.f32 %v470_v4, %v469_v2  ;;  %v383_v9 = vpop.f32.mrf.mxu1 }
 0x17e   :  { %v472_v10 = vsel %vm83_vm0, %v461_v6, 0.0  ;;  %v384_v11 = vadd.f32 %v383_v9, %v261_v45  ;;  %v464_v14 = vmul.f32 %v717_v34, %v389_v7 }
 0x17f   :  { %v473_v12 = vadd.f32 %v472_v10, %v471_v8 }
 0x180   :  { %v463_v15 = vmul.f32 %v715_v31, %v384_v11  ;;  %v478_v21 = vsel %vm83_vm0, %v464_v14, 0.0 }
 0x181   :  { %v475_v17 = vadd.f32 %v474_v13, %v473_v12 }
 0x182   :  { %v476_v19 = vsel %vm83_vm0, %v463_v15, 0.0 }
 0x183   :  { %v477_v20 = vadd.f32 %v476_v19, %v475_v17 }
 0x185   :  { %v479_v23 = vadd.f32 %v478_v21, %v477_v20 }
 0x187   :  { %v480_v24 = vadd.f32 %v479_v23, %v456_v22 }
 0x189   :  { %481 = vst.msk [vmem:[#allocation4] sm:$0xff] %vm83_vm0, %v480_v24 }
 0x190   :  { %v486_v26 = vld [vmem:[#allocation4] sm:$0xff] }
 0x191   :  { %v489_v27 = vmul.f32 %v721_v25, %v486_v26 }
 0x193   :  { %689 = vmatmul.mubr.msk.f32.vlgmr.msra.gmra.mxu0 %vm83_vm0, %v489_v27 }
 0x253   :  { %v570_v29 = vpop.f32.mrf.mxu0 }
 0x254   :  { %v571_v30 = vadd.f32 %v609_v28, %v570_v29 }
 0x255   :  { %v690_v31 = vpop.f32.mrf.mxu0 }
 0x256   :  { %574 = vst.msk [vmem:[#allocation13] sm:$0xff] %vm83_vm0, %v571_v30 }
 0x257   :  { %813 = shalt.err (!%p810_p10)
}
 0x258   :  { %584 = dma.vmem_to_hbm [thread:$0]  %s582_s20, 128, %s974_s6, [#allocation7]  }
 0x259   :  { %828 = dma.done.wait [#allocation7], 128  }
 0x25a   :  { %829 = vsyncadd [#allocation7], 4294967168 }
 0x25b   :  { %588 = vsyncpa [#allocation6], 1 }
 0x25c   :  { %589 = vsyncpa [#allocation9], 1 }
 0x25d   :  { %590 = vsyncpa [#allocation12], 1 }
 0x25e   :  { %591 = vsyncpa [#allocation7], 1 }

</bundles_post_ra>
